<compile_context>
chip_gen: v5e
topology: v5e:2x2
jax: 0.10.0
libtpu: 0.0.40
codegen_flags: <defaults>
</compile_context>

<pallas_src>
import functools

import jax
import jax.numpy as jnp
from jax import lax
from jax.experimental import pallas as pl
from jax.experimental.pallas import tpu as pltpu

_SUBLANE = 8  # f32 sublane tile


def _round_up(x, m):
    return (x + m - 1) // m * m


def _fmix32(x):
    """murmur3 finalizer: good avalanche, pure 32-bit VPU integer ops."""
    x = x ^ (x >> jnp.uint32(16))
    x = x * jnp.uint32(0x85EBCA6B)
    x = x ^ (x >> jnp.uint32(13))
    x = x * jnp.uint32(0xC2B2AE35)
    x = x ^ (x >> jnp.uint32(16))
    return x


def _pick_token_block(n_tokens, d_embed, itemsize):
    # out double-buffer (2*T*D*itemsize) + f32 accumulator (T*D*4) <= ~6 MiB
    budget = 6 * 1024 * 1024
    t = budget // (d_embed * (2 * itemsize + 4))
    t = max(_SUBLANE, min(512, (t // _SUBLANE) * _SUBLANE))
    return min(t, _round_up(n_tokens, _SUBLANE))


def _pick_vocab_block(vocab, d_embed, itemsize, token_block):
    v8 = _round_up(vocab, _SUBLANE)
    # table block double-buffer <= ~4 MiB
    vb_table = (4 * 1024 * 1024) // (d_embed * itemsize)
    # (token_block, vocab_block) f32 one-hot intermediate <= ~2 MiB
    vb_onehot = (2 * 1024 * 1024) // (4 * token_block)
    vb = max(_SUBLANE, (min(vb_table, vb_onehot) // _SUBLANE) * _SUBLANE)
    return min(vb, v8)


def _embed_dropout_kernel(seed_ref, ids_ref, table_ref, out_ref, acc_ref, *,
                          drop_p: float, token_block: int, vocab_block: int,
                          d_embed: int):
    t = pl.program_id(0)                 # token-block index (parallel)
    v = pl.program_id(1)                 # vocab-block index (reduction)
    nv = pl.num_programs(1)

    # ---- Partial gather for this vocab block: exact one-hot MXU matmul.
    # onehot (T, Vb) @ table_block (Vb, D) contributes the rows whose ids fall
    # inside this vocab block; everything else contributes exact zeros.
    ids = ids_ref[...]                                            # (T, 1) int32
    vocab_iota = (v * vocab_block
                  + lax.broadcasted_iota(jnp.int32,
                                         (token_block, vocab_block), 1))
    onehot = (ids == vocab_iota).astype(table_ref.dtype)          # (T, Vb)
    partial = jnp.dot(onehot, table_ref[...],
                      preferred_element_type=jnp.float32)         # (T, D) f32

    @pl.when(v == 0)
    def _():
        acc_ref[...] = partial

    @pl.when(v != 0)
    def _():
        acc_ref[...] += partial

    # ---- Finalize on the last vocab block: dropout + store.
    @pl.when(v == nv - 1)
    def _():
        emb = acc_ref[...]
        if drop_p > 0.0:
            rows = lax.broadcasted_iota(jnp.int32, (token_block, d_embed), 0)
            cols = lax.broadcasted_iota(jnp.int32, (token_block, d_embed), 1)
            pos = ((t * token_block + rows) * d_embed + cols).astype(jnp.uint32)
            key = seed_ref[0].astype(jnp.uint32) * jnp.uint32(0x9E3779B1)
            bits = _fmix32(pos + key + jnp.uint32(1))
            # 31-bit integer threshold compare: no float conversion, sign-safe.
            r31 = (bits >> jnp.uint32(1)).astype(jnp.int32)       # [0, 2^31)
            thresh = jnp.int32(min(2**31 - 1, int(round(drop_p * 2.0**31))))
            keep = r31 >= thresh
            scale = jnp.float32(1.0 / (1.0 - drop_p))
            emb = emb * jnp.where(keep, scale, jnp.float32(0.0))
        out_ref[...] = emb.astype(out_ref.dtype)


def embed_net_forward(sequence, embed_table, drop_p: float, seed: int = 0,
                      token_block: int | None = None,
                      vocab_block: int | None = None):
    """Pallas implementation of EmbedNet.forward.

    sequence    : (B, S) integer token ids
    embed_table : (vocab_size, d_embed)
    returns     : (B, S, d_embed) in embed_table.dtype
    """
    B, S = sequence.shape
    V, D = embed_table.shape
    assert D % 128 == 0, "d_embed must be lane-aligned (multiple of 128)"
    assert V < 2**31, "vocab must fit int32 ids"
    assert 0.0 <= float(drop_p) < 1.0, "dropout p must be in [0, 1)"

    itemsize = embed_table.dtype.itemsize
    N = B * S

    if token_block is None:
        token_block = _pick_token_block(N, D, itemsize)
    token_block = _round_up(int(token_block), _SUBLANE)
    N_pad = _round_up(N, token_block)
    n_tok = N_pad // token_block

    if vocab_block is None:
        vocab_block = _pick_vocab_block(V, D, itemsize, token_block)
    vocab_block = _round_up(int(vocab_block), _SUBLANE)
    V_pad = _round_up(V, vocab_block)
    n_voc = V_pad // vocab_block

    table = embed_table
    if V_pad != V:
        # Zero rows never match a real token id, so they contribute nothing.
        table = jnp.pad(embed_table, ((0, V_pad - V), (0, 0)))

    ids = sequence.reshape(-1).astype(jnp.int32)
    ids = jnp.pad(ids, (0, N_pad - N)).reshape(N_pad, 1)
    seed_arr = jnp.array([seed], dtype=jnp.int32)

    # VMEM budget: double-buffered table + output blocks, lane-padded ids
    # blocks, the f32 accumulator, and the (T, Vb) one-hot intermediate.
    footprint = (2 * vocab_block * D * itemsize
                 + 2 * token_block * D * itemsize
                 + 2 * token_block * 128 * 4
                 + token_block * D * 4
                 + 2 * token_block * vocab_block * 4)
    vmem_limit = int(min(56 * 1024 * 1024,
                         max(32 * 1024 * 1024, footprint + 16 * 1024 * 1024)))

    kernel = functools.partial(_embed_dropout_kernel, drop_p=float(drop_p),
                               token_block=token_block,
                               vocab_block=vocab_block, d_embed=D)

    out = pl.pallas_call(
        kernel,
        out_shape=jax.ShapeDtypeStruct((N_pad, D), embed_table.dtype),
        grid_spec=pltpu.PrefetchScalarGridSpec(
            num_scalar_prefetch=1,                 # seed -> SMEM
            grid=(n_tok, n_voc),
            in_specs=[
                pl.BlockSpec((token_block, 1), lambda t, v, seed: (t, 0)),
                pl.BlockSpec((vocab_block, D), lambda t, v, seed: (v, 0)),
            ],
            out_specs=pl.BlockSpec((token_block, D),
                                   lambda t, v, seed: (t, 0)),
            scratch_shapes=[pltpu.VMEM((token_block, D), jnp.float32)],
        ),
        compiler_params=pltpu.CompilerParams(
            dimension_semantics=("parallel", "arbitrary"),
            vmem_limit_bytes=vmem_limit),
    )(seed_arr, ids, table)

    return out[:N].reshape(B, S, D)


if __name__ == "__main__":
    # Small, deterministic setup consistent with EmbedNet(vocab_size, d_embed, drop).
    vocab_size = 64
    d_embed = 128
    drop = 0.1
    batch, seq = 2, 8

    key = jax.random.PRNGKey(0)
    k_embed, k_ids = jax.random.split(key)

    # nn.init.uniform_(embed.weight, a=-0.05, b=0.05)
    embed_table = jax.random.uniform(
        k_embed, (vocab_size, d_embed), dtype=jnp.float32,
        minval=-0.05, maxval=0.05)

    sequence = jax.random.randint(k_ids, (batch, seq), 0, vocab_size,
                                  dtype=jnp.int32)

    ref = embed_table[sequence]   # pure-JAX reference embedding lookup

    # 1) Gather path, dropout disabled (single vocab block) -> exact match.
    out_nodrop = jax.block_until_ready(
        embed_net_forward(sequence, embed_table, drop_p=0.0))
    assert out_nodrop.shape == (batch, seq, d_embed)
    assert jnp.allclose(out_nodrop, ref, atol=1e-6), "embedding gather mismatch"

    # 2) Multi-vocab-block accumulation path (forced small vocab_block) -> exact.
    out_tiled = jax.block_until_ready(
        embed_net_forward(sequence, embed_table, drop_p=0.0, vocab_block=8))
    assert jnp.allclose(out_tiled, ref, atol=1e-6), "vocab-tiled gather mismatch"

    # 3) Full forward with dropout: every element is either exactly 0 (dropped)
    #    or the embedding value scaled by 1/(1-p).
    out = jax.block_until_ready(
        embed_net_forward(sequence, embed_table, drop_p=drop, seed=1234))
    assert out.shape == (batch, seq, d_embed)
    assert bool(jnp.all(jnp.isfinite(out)))
    scaled = ref / (1.0 - drop)
    valid = jnp.isclose(out, scaled, rtol=1e-5, atol=1e-6) | (out == 0.0)
    assert bool(jnp.all(valid)), "dropout output not in {0, x/(1-p)}"
    drop_frac = float(jnp.mean(out == 0.0))
    assert 0.0 < drop_frac < 0.5, f"implausible drop fraction {drop_frac}"

    # TODO(synk): dropout mask uses a counter-based hash, so it will not be
    # bit-identical to torch's RNG stream (semantics/scaling are identical).
    print("KERNEL_OK")
</pallas_src>

<mosaic_0001>
module attributes {stable_mosaic.version = 11 : i64} {
  func.func @_embed_dropout_kernel(%arg0: i32, %arg1: i32, %arg2: memref<1xi32, #tpu.memory_space<smem>>, %arg3: memref<16x1xi32, #tpu.memory_space<vmem>>, %arg4: memref<64x128xf32, #tpu.memory_space<vmem>>, %arg5: memref<16x128xf32, #tpu.memory_space<vmem>>, %arg6: memref<16x128xf32, #tpu.memory_space<vmem>>) attributes {dimension_semantics = [#tpu.dimension_semantics<parallel>, #tpu.dimension_semantics<arbitrary>], iteration_bounds = array<i64: 1, 1>, scalar_prefetch = 1 : i64, scratch_operands = 1 : i64, tpu.core_type = #tpu.core_type<tc>, window_params = [{transform_indices = @transform_0, window_bounds = array<i64: 16, 1>}, {transform_indices = @transform_1, window_bounds = array<i64: 64, 128>}, {transform_indices = @transform_2, window_bounds = array<i64: 16, 128>}]} {
    %c0 = arith.constant 0 : index
    %c0_0 = arith.constant 0 : index
    %0 = vector.load %arg3[%c0, %c0_0] : memref<16x1xi32, #tpu.memory_space<vmem>>, vector<16x1xi32>
    %c64_i32 = arith.constant 64 : i32
    %1 = arith.muli %arg1, %c64_i32 : i32
    %2 = tpu.iota {dimensions = array<i32: 1>} : vector<16x64xi32>
    %3 = vector.broadcast %1 : i32 to vector<16x64xi32>
    %4 = arith.addi %3, %2 : vector<16x64xi32>
    %5 = vector.broadcast %0 : vector<16x1xi32> to vector<16x64xi32>
    %6 = arith.cmpi eq, %5, %4 : vector<16x64xi32>
    %7 = arith.extui %6 : vector<16x64xi1> to vector<16x64xi32>
    %8 = arith.sitofp %7 : vector<16x64xi32> to vector<16x64xf32>
    %c0_1 = arith.constant 0 : index
    %c0_2 = arith.constant 0 : index
    %9 = vector.load %arg4[%c0_1, %c0_2] : memref<64x128xf32, #tpu.memory_space<vmem>>, vector<64x128xf32>
    %cst = arith.constant dense<0.000000e+00> : vector<16x128xf32>
    %10 = tpu.matmul %8, %9, %cst {dimension_numbers = #tpu.dot_dimension_numbers<[1], [0], [0], [1], [0, 0, 1, 1], [], []>} : vector<16x64xf32>, vector<64x128xf32>, vector<16x128xf32> -> vector<16x128xf32>
    %c0_i32 = arith.constant 0 : i32
    %11 = arith.cmpi eq, %arg1, %c0_i32 : i32
    %12 = arith.extui %11 : i1 to i32
    %c0_i32_3 = arith.constant 0 : i32
    %13 = arith.cmpi ne, %12, %c0_i32_3 : i32
    scf.if %13 {
      %c0_8 = arith.constant 0 : index
      %c0_9 = arith.constant 0 : index
      %20 = vector.load %arg6[%c0_8, %c0_9] : memref<16x128xf32, #tpu.memory_space<vmem>>, vector<16x128xf32>
      tpu.vector_store %arg6[%c0_8, %c0_9], %10 {strides = array<i32>} : memref<16x128xf32, #tpu.memory_space<vmem>>, vector<16x128xf32>,
    } else {
    }
    %c0_i32_4 = arith.constant 0 : i32
    %14 = arith.cmpi ne, %arg1, %c0_i32_4 : i32
    %15 = arith.extui %14 : i1 to i32
    %c0_i32_5 = arith.constant 0 : i32
    %16 = arith.cmpi ne, %15, %c0_i32_5 : i32
    scf.if %16 {
      %c0_8 = arith.constant 0 : index
      %c0_9 = arith.constant 0 : index
      %20 = vector.load %arg6[%c0_8, %c0_9] : memref<16x128xf32, #tpu.memory_space<vmem>>, vector<16x128xf32>
      %21 = arith.addf %20, %10 : vector<16x128xf32>
      %c0_10 = arith.constant 0 : index
      %c0_11 = arith.constant 0 : index
      %22 = vector.load %arg6[%c0_10, %c0_11] : memref<16x128xf32, #tpu.memory_space<vmem>>, vector<16x128xf32>
      tpu.vector_store %arg6[%c0_10, %c0_11], %21 {strides = array<i32>} : memref<16x128xf32, #tpu.memory_space<vmem>>, vector<16x128xf32>,
    } else {
    }
    %c0_i32_6 = arith.constant 0 : i32
    %17 = arith.cmpi eq, %arg1, %c0_i32_6 : i32
    %18 = arith.extui %17 : i1 to i32
    %c0_i32_7 = arith.constant 0 : i32
    %19 = arith.cmpi ne, %18, %c0_i32_7 : i32
    scf.if %19 {
      %c0_8 = arith.constant 0 : index
      %c0_9 = arith.constant 0 : index
      %20 = vector.load %arg6[%c0_8, %c0_9] : memref<16x128xf32, #tpu.memory_space<vmem>>, vector<16x128xf32>
      %c0_10 = arith.constant 0 : index
      %c0_11 = arith.constant 0 : index
      %21 = vector.load %arg5[%c0_10, %c0_11] : memref<16x128xf32, #tpu.memory_space<vmem>>, vector<16x128xf32>
      tpu.vector_store %arg5[%c0_10, %c0_11], %20 {strides = array<i32>} : memref<16x128xf32, #tpu.memory_space<vmem>>, vector<16x128xf32>,
    } else {
    }
    return
  }
  func.func @transform_0(%arg0: i32, %arg1: i32, %arg2: memref<1xi32, #tpu.memory_space<smem>>) -> (i32, i32) {
    %c0_i32 = arith.constant 0 : i32
    %c0_i32_0 = arith.constant 0 : i32
    return %arg0, %c0_i32 : i32, i32
  }
  func.func @transform_1(%arg0: i32, %arg1: i32, %arg2: memref<1xi32, #tpu.memory_space<smem>>) -> (i32, i32) {
    %c0_i32 = arith.constant 0 : i32
    %c0_i32_0 = arith.constant 0 : i32
    return %arg1, %c0_i32 : i32, i32
  }
  func.func @transform_2(%arg0: i32, %arg1: i32, %arg2: memref<1xi32, #tpu.memory_space<smem>>) -> (i32, i32) {
    %c0_i32 = arith.constant 0 : i32
    %c0_i32_0 = arith.constant 0 : i32
    return %arg0, %c0_i32 : i32, i32
  }
}

</mosaic_0001>

<bundles_post_ra>
// kernel: tpu_custom_call.1
= control target key start
LH: loop header
LB: loop body
LE: loop exit
PB: predicated region body
PF: predicated region fallthrough
CT: control target
= control target key end

     0   :  { %9 = vsyncpa [#allocation6], 0  ;;  %s244_s0 = inlined_call_operand.<no memory space> [shape: s32[1], index: 0, kind: input, shape index: {}]   ;;  %s245_s1 = inlined_call_operand.vmem [shape: s32[16,1], index: 1, kind: input, shape index: {}]   ;;  %s246_s2 = inlined_call_operand.hbm [shape: f32[64,128], index: 2, kind: input, shape index: {}]   ;;  %s247_s3 = inlined_call_operand.hbm [shape: f32[16,128], index: 3, kind: output, shape index: {}]  }
   0x1   :  { %10 = vsyncpa [#allocation7], 0  ;;  %s17_s14 = sshll.u32 %s246_s2, 4  ;;  %s200_s15 = smov [#allocation5]   ;;  %s18_s14 = int_to_ptr.hbm [resolvable:$true] %s17_s14 }
   0x2   :  { %s19_s16 = sshll.u32 %s200_s15, 4  ;;  %s201_s0 = smov 128   ;;  %s20_s16 = int_to_ptr.vmem [resolvable:$true] %s19_s16 }
   0x3   :  { %s202_s17 = smov 8  }
   0x4   :  { %25 = dma.hbm_to_vmem [thread:$0]  %s18_s14, 1024, %s20_s16, [#allocation6], %s201_s0, %s201_s0, %s202_s17  }
   0x5   :  { %196 = dma.done.wait [#allocation6], 1024  }
   0x6   :  { %197 = vsyncadd [#allocation6], 4294966272  ;;  %v203_v0 = vmov 0   ;;  %v30_v1 = vld [vmem:[%s245_s1] sm:$0xff]  ;;  %v56_v2 = vld [vmem:[#allocation5 + $0x38] sm:$0xff]  ;;  %v33_v11 = vlaneseq  ;;  %vm57_vm0 = vcmask 523264  }
   0x7   :  { %147 = vset.pattern.permute.xlu0 %v203_v0  ;;  %72 = vmatpush.msra.mxu0 %v56_v2  ;;  %v55_v3 = vld [vmem:[#allocation5 + $0x30] sm:$0xff]  ;;  %v54_v4 = vld [vmem:[#allocation5 + $0x28] sm:$0xff]  ;;  %v53_v5 = vld [vmem:[#allocation5 + $0x20] sm:$0xff]  ;;  %v204_v14 = vmov 0.0   ;;  %s116_s24 = sshll.u32 %s247_s3, 4  ;;  %s117_s24 = int_to_ptr.hbm [resolvable:$true] %s116_s24 }
   0x8   :  { %38 = vperm.xlu0 %147, %v30_v1   ;;  %133 = vmatpush.msra.mxu1 %v56_v2  ;;  %v31_v6 = vld [vmem:[%s245_s1 + $0x8] sm:$0xff]  ;;  %v52_v7 = vld [vmem:[#allocation5 + $0x18] sm:$0xff]  ;;  %v51_v8 = vld [vmem:[#allocation5 + $0x10] sm:$0xff]  ;;  %v34_v12 = vand.u32 127, %v33_v11  ;;  %s205_s1 = smov [#allocation8]  }
   0x9   :  { %73 = vmatpush.msra.mxu0 %v55_v3  ;;  %v50_v9 = vld [vmem:[#allocation5 + $0x8] sm:$0xff]  ;;  %v49_v10 = vld [vmem:[#allocation5] sm:$0xff]  ;;  %s114_s21 = sshll.u32 %s205_s1, 4  ;;  %s115_s21 = int_to_ptr.vmem [resolvable:$true] %s114_s21 }
   0xa   :  { %134 = vmatpush.msra.mxu1 %v55_v3 }
   0xb   :  { %74 = vmatpush.msra.mxu0 %v54_v4 }
   0xc   :  { %135 = vmatpush.msra.mxu1 %v54_v4 }
   0xd   :  { %75 = vmatpush.msra.mxu0 %v53_v5 }
   0xe   :  { %136 = vmatpush.msra.mxu1 %v53_v5 }
   0xf   :  { %76 = vmatpush.msra.mxu0 %v52_v7 }
  0x10   :  { %41 = vperm.xlu0 %147, %v31_v6   ;;  %137 = vmatpush.msra.mxu1 %v52_v7 }
  0x11   :  { %77 = vmatpush.msra.mxu0 %v51_v8 }
  0x12   :  { %138 = vmatpush.msra.mxu1 %v51_v8 }
  0x13   :  { %78 = vmatpush.msra.mxu0 %v50_v9 }
  0x14   :  { %139 = vmatpush.msra.mxu1 %v50_v9 }
  0x15   :  { %79 = vmatpush.msra.mxu0 %v49_v10 }
  0x16   :  { %140 = vmatpush.msra.mxu1 %v49_v10 }
  0x7a   :  { %v39_v13 = vpop.permute.xlu0 %38 }
  0x7b   :  { %vm43_vm1 = vcmp.eq.s32.totalorder %v39_v13, %v34_v12 }
  0x7c   :  { %v129_v15 = vsel %vm43_vm1, 1.0, %v204_v14 }
  0x7d   :  { %131 = vmatmul.msk.f32.vlgmr.msra.gmra.mxu0 %vm57_vm0, %v129_v15 }
  0x82   :  { %v42_v16 = vpop.permute.xlu0 %41 }
  0x83   :  { %vm44_vm2 = vcmp.eq.s32.totalorder %v42_v16, %v34_v12 }
  0x84   :  { %v130_v17 = vsel %vm44_vm2, 1.0, %v204_v14 }
  0x85   :  { %132 = vmatmul.msk.f32.vlgmr.msra.gmra.mxu1 %vm57_vm0, %v130_v17 }
  0xfa   :  { %v81_v18 = vpop.f32.mrf.mxu0 }
  0xfb   :  { %108 = vst [vmem:[#allocation8] sm:$0xff] %v81_v18 }
 0x102   :  { %v84_v19 = vpop.f32.mrf.mxu1 }
 0x103   :  { %109 = vst [vmem:[#allocation8 + $0x8] sm:$0xff] %v84_v19 }
 0x104   :  { %122 = dma.vmem_to_hbm [thread:$0]  %s115_s21, 256, %s117_s24, [#allocation7], %s201_s0, %s201_s0, %s202_s17  }
 0x105   :  { %198 = dma.done.wait [#allocation7], 256  }
 0x106   :  { %199 = vsyncadd [#allocation7], 4294967040 }
 0x107   :  { %127 = vsyncpa [#allocation6], 1 }
 0x108   :  { %128 = vsyncpa [#allocation7], 1 }

</bundles_post_ra>
